<compile_context>
chip_gen: v6e
topology: v6e:2x2x1
jax: 0.10.0
libtpu: 0.0.40
codegen_flags: <defaults>
</compile_context>

<pallas_src>
import math
import functools

import jax
import jax.numpy as jnp
from jax.experimental import pallas as pl
from jax.experimental.pallas import tpu as pltpu


# ---------------------------------------------------------------------------
# Kernels
# ---------------------------------------------------------------------------
def _stats_kernel(p_ref, w_ref, g_ref, b_ref, scale_ref, shift_ref,
                  sum_ref, sq_ref, *, m_true, eps):
    """Grid (M_tiles,). Streaming per-channel BN stats -> fused scale/shift."""
    mt = pl.program_id(0)

    @pl.when(mt == 0)
    def _():
        sum_ref[...] = jnp.zeros_like(sum_ref)
        sq_ref[...] = jnp.zeros_like(sq_ref)

    # One block-diagonal matmul covers every dilation branch at once.
    conv = jnp.dot(p_ref[...], w_ref[...], preferred_element_type=jnp.float32)
    sum_ref[...] += jnp.sum(conv, axis=0, keepdims=True)
    sq_ref[...] += jnp.sum(conv * conv, axis=0, keepdims=True)

    @pl.when(mt == pl.num_programs(0) - 1)
    def _():
        inv_m = 1.0 / m_true                       # true M (zero pad rows add 0)
        mu = sum_ref[...] * inv_m
        var = jnp.maximum(sq_ref[...] * inv_m - mu * mu, 0.0)
        scale = g_ref[...] * jax.lax.rsqrt(var + eps)
        scale_ref[...] = scale
        shift_ref[...] = b_ref[...] - mu * scale


def _apply_kernel(p_ref, w_ref, scale_ref, shift_ref, o_ref, *, nd, cpad):
    """Grid (M_tiles,). Fused conv + folded BN + SiLU + mean over dilations."""
    conv = jnp.dot(p_ref[...], w_ref[...], preferred_element_type=jnp.float32)
    y = conv * scale_ref[...] + shift_ref[...]     # folded BatchNorm
    y = y * jax.nn.sigmoid(y)                      # SiLU
    # Mean over dilation branches: static, lane-aligned (128-multiple) slices.
    acc = y[:, 0:cpad]
    for d in range(1, nd):
        acc = acc + y[:, d * cpad:(d + 1) * cpad]
    o_ref[...] = acc * (1.0 / nd)                  # single lane-dense store


# ---------------------------------------------------------------------------
# Wrapper
# ---------------------------------------------------------------------------
def ms_patch_emb(x, weights, biases, gammas, betas, *,
                 kernel_size, stride, dilations, groups,
                 eps=1e-6, compute_dtype=jnp.bfloat16, tile_m=512):
    """x: [N, Cin, H, W] (NCHW). weights: [ND, Cout, Cin//groups, KH, KW]."""
    # A per-channel conv bias added before training-mode BatchNorm is exactly
    # cancelled by the mean subtraction (and does not affect the variance),
    # so it is intentionally unused.
    del biases

    N, Cin, H, W = x.shape
    ND = len(dilations)
    Cout = weights.shape[1]
    KH = KW = kernel_size
    assert Cin % groups == 0 and Cout % groups == 0
    in_pg, out_pg = Cin // groups, Cout // groups

    pads = [math.ceil(((kernel_size - 1) * d + 1 - stride) / 2) for d in dilations]
    ohs = [(H + 2 * p - d * (kernel_size - 1) - 1) // stride + 1
           for d, p in zip(dilations, pads)]
    ows = [(W + 2 * p - d * (kernel_size - 1) - 1) // stride + 1
           for d, p in zip(dilations, pads)]
    assert len(set(ohs)) == 1 and len(set(ows)) == 1, \
        "dilation branches must produce equal spatial sizes to be averaged"
    OH, OW = ohs[0], ows[0]
    M = N * OH * OW
    K = KH * KW * Cin
    NDK = ND * K
    Cpad = max(128, ((Cout + 127) // 128) * 128)        # lane-dense output
    NDC = ND * Cpad

    # --- M tiling (multiple of 8 sublanes) ---
    TM = min(tile_m, ((M + 7) // 8) * 8)
    TM = ((TM + 7) // 8) * 8
    M_pad = ((M + TM - 1) // TM) * TM
    n_mt = M_pad // TM

    # --- glue: shared max-padded input + per-dilation im2col, concatenated
    #     along K so one matmul covers all dilations (layout only) ---
    x_nhwc = jnp.transpose(x, (0, 2, 3, 1)).astype(jnp.float32)
    pmax = max(pads)
    xp = jnp.pad(x_nhwc, ((0, 0), (pmax, pmax), (pmax, pmax), (0, 0)))
    patch_list = []
    for d, p in zip(dilations, pads):
        off = pmax - p
        taps = []
        for kh in range(KH):
            for kw in range(KW):
                r0, c0 = off + kh * d, off + kw * d
                taps.append(xp[:, r0:r0 + stride * (OH - 1) + 1:stride,
                                  c0:c0 + stride * (OW - 1) + 1:stride, :])
        patch_list.append(jnp.concatenate(taps, axis=-1).reshape(M, K))
    patches = jnp.concatenate(patch_list, axis=-1)                # [M, ND*K]
    patches = jnp.pad(patches, ((0, M_pad - M), (0, 0))).astype(compute_dtype)

    # --- glue: grouped weights -> block-diagonal [ND*K, ND*Cpad] ---
    w_big = jnp.zeros((NDK, NDC), jnp.float32)
    for d in range(ND):
        wd = jnp.zeros((Cout, Cin, KH, KW), jnp.float32)
        for g in range(groups):
            wd = wd.at[g * out_pg:(g + 1) * out_pg,
                       g * in_pg:(g + 1) * in_pg].set(
                weights[d, g * out_pg:(g + 1) * out_pg].astype(jnp.float32))
        w_mat = jnp.transpose(wd, (2, 3, 1, 0)).reshape(K, Cout)  # (kh,kw,cin)->cout
        w_big = w_big.at[d * K:(d + 1) * K, d * Cpad:d * Cpad + Cout].set(w_mat)
    w_big = w_big.astype(compute_dtype)

    g2 = jnp.concatenate(
        [jnp.pad(gammas[d].astype(jnp.float32), (0, Cpad - Cout)) for d in range(ND)]
    ).reshape(1, NDC)
    b2 = jnp.concatenate(
        [jnp.pad(betas[d].astype(jnp.float32), (0, Cpad - Cout)) for d in range(ND)]
    ).reshape(1, NDC)

    vmem_bytes = 32 * 1024 * 1024

    # ---- Pass 1: streaming BN statistics -> per-channel scale/shift ----
    scale, shift = pl.pallas_call(
        functools.partial(_stats_kernel, m_true=float(M), eps=eps),
        out_shape=(jax.ShapeDtypeStruct((1, NDC), jnp.float32),
                   jax.ShapeDtypeStruct((1, NDC), jnp.float32)),
        grid_spec=pltpu.PrefetchScalarGridSpec(
            num_scalar_prefetch=0,
            grid=(n_mt,),
            in_specs=[
                pl.BlockSpec((TM, NDK), lambda mt: (mt, 0)),
                pl.BlockSpec((NDK, NDC), lambda mt: (0, 0)),
                pl.BlockSpec((1, NDC), lambda mt: (0, 0)),
                pl.BlockSpec((1, NDC), lambda mt: (0, 0)),
            ],
            out_specs=[pl.BlockSpec((1, NDC), lambda mt: (0, 0)),
                       pl.BlockSpec((1, NDC), lambda mt: (0, 0))],
            scratch_shapes=[pltpu.VMEM((1, NDC), jnp.float32),
                            pltpu.VMEM((1, NDC), jnp.float32)]),
        compiler_params=pltpu.CompilerParams(
            dimension_semantics=("arbitrary",),
            vmem_limit_bytes=vmem_bytes),
    )(patches, w_big, g2, b2)

    # ---- Pass 2: fused conv + folded BN + SiLU + mean over dilations ----
    out = pl.pallas_call(
        functools.partial(_apply_kernel, nd=ND, cpad=Cpad),
        out_shape=jax.ShapeDtypeStruct((M_pad, Cpad), jnp.float32),
        grid_spec=pltpu.PrefetchScalarGridSpec(
            num_scalar_prefetch=0,
            grid=(n_mt,),
            in_specs=[
                pl.BlockSpec((TM, NDK), lambda mt: (mt, 0)),
                pl.BlockSpec((NDK, NDC), lambda mt: (0, 0)),
                pl.BlockSpec((1, NDC), lambda mt: (0, 0)),
                pl.BlockSpec((1, NDC), lambda mt: (0, 0)),
            ],
            out_specs=pl.BlockSpec((TM, Cpad), lambda mt: (mt, 0))),
        compiler_params=pltpu.CompilerParams(
            dimension_semantics=("parallel",),
            vmem_limit_bytes=vmem_bytes),
    )(patches, w_big, scale, shift)

    out = out[:M, :Cout].reshape(N, OH, OW, Cout)
    return jnp.transpose(out, (0, 3, 1, 2))                      # back to NCHW


# ---------------------------------------------------------------------------
# Pure-JAX reference (matches the PyTorch forward, training-mode BN, with bias)
# ---------------------------------------------------------------------------
def _reference(x, weights, biases, gammas, betas, ks, stride, dilations, groups, eps=1e-6):
    outs = []
    for i, d in enumerate(dilations):
        pad = math.ceil(((ks - 1) * d + 1 - stride) / 2)
        conv = jax.lax.conv_general_dilated(
            x, weights[i], window_strides=(stride, stride),
            padding=[(pad, pad), (pad, pad)], rhs_dilation=(d, d),
            feature_group_count=groups,
            dimension_numbers=('NCHW', 'OIHW', 'NCHW'))
        conv = conv + biases[i][None, :, None, None]
        mu = conv.mean(axis=(0, 2, 3), keepdims=True)
        var = jnp.square(conv - mu).mean(axis=(0, 2, 3), keepdims=True)
        y = (conv - mu) / jnp.sqrt(var + eps)
        y = y * gammas[i][None, :, None, None] + betas[i][None, :, None, None]
        y = y * jax.nn.sigmoid(y)
        outs.append(y)
    return jnp.mean(jnp.stack(outs, axis=-1), axis=-1)


if __name__ == "__main__":
    key = jax.random.PRNGKey(0)

    # Small shapes consistent with the module: dim_in=4, emb_dim=8, 16x16 input.
    N, Cin, H, W = 2, 4, 16, 16
    Cout = 8
    kernel_size, stride = 2, 2
    dilations = (1, 2, 3)
    groups = math.gcd(Cin, Cout)          # c_group == -1 path
    ND = len(dilations)

    ks = jax.random.split(key, 5)
    x = jax.random.normal(ks[0], (N, Cin, H, W), dtype=jnp.float32)
    weights = 0.3 * jax.random.normal(
        ks[1], (ND, Cout, Cin // groups, kernel_size, kernel_size), jnp.float32)
    biases = 0.1 * jax.random.normal(ks[2], (ND, Cout), jnp.float32)
    gammas = 1.0 + 0.1 * jax.random.normal(ks[3], (ND, Cout), jnp.float32)
    betas = 0.1 * jax.random.normal(ks[4], (ND, Cout), jnp.float32)

    ref = _reference(x, weights, biases, gammas, betas,
                     kernel_size, stride, dilations, groups)

    # f32 matmul path with a deliberately small tile so that multiple M tiles
    # and zero-padded tail rows (streaming BN stats) are exercised.
    out_f32 = ms_patch_emb(x, weights, biases, gammas, betas,
                           kernel_size=kernel_size, stride=stride,
                           dilations=dilations, groups=groups,
                           compute_dtype=jnp.float32, tile_m=48)
    out_f32 = jax.block_until_ready(out_f32)
    assert out_f32.shape == ref.shape == (N, Cout, H // stride, W // stride)
    err_f32 = float(jnp.max(jnp.abs(out_f32 - ref)))
    assert err_f32 < 1e-4, f"f32 path mismatch vs reference: {err_f32}"

    # Default path: bf16 matmul operands, f32 accumulation / BN / SiLU.
    out_bf16 = ms_patch_emb(x, weights, biases, gammas, betas,
                            kernel_size=kernel_size, stride=stride,
                            dilations=dilations, groups=groups)
    out_bf16 = jax.block_until_ready(out_bf16)
    err_bf16 = float(jnp.max(jnp.abs(out_bf16 - ref)))
    assert err_bf16 < 5e-2, f"bf16 path mismatch vs reference: {err_bf16}"

    print("KERNEL_OK")
</pallas_src>

<mosaic_0001>
module attributes {stable_mosaic.version = 11 : i64} {
  func.func @_stats_kernel(%arg0: i32, %arg1: memref<48x48xf32, #tpu.memory_space<vmem>>, %arg2: memref<48x384xf32, #tpu.memory_space<vmem>>, %arg3: memref<1x384xf32, #tpu.memory_space<vmem>>, %arg4: memref<1x384xf32, #tpu.memory_space<vmem>>, %arg5: memref<1x384xf32, #tpu.memory_space<vmem>>, %arg6: memref<1x384xf32, #tpu.memory_space<vmem>>, %arg7: memref<1x384xf32, #tpu.memory_space<vmem>>, %arg8: memref<1x384xf32, #tpu.memory_space<vmem>>) attributes {dimension_semantics = [#tpu.dimension_semantics<arbitrary>], iteration_bounds = array<i64: 3>, scalar_prefetch = 0 : i64, scratch_operands = 2 : i64, tpu.core_type = #tpu.core_type<tc>, window_params = [{transform_indices = @transform_0, window_bounds = array<i64: 48, 48>}, {pipeline_mode = #tpu.pipeline_mode<synchronous>, transform_indices = @transform_1, window_bounds = array<i64: 48, 384>}, {pipeline_mode = #tpu.pipeline_mode<synchronous>, transform_indices = @transform_2, window_bounds = array<i64: 1, 384>}, {pipeline_mode = #tpu.pipeline_mode<synchronous>, transform_indices = @transform_3, window_bounds = array<i64: 1, 384>}, {pipeline_mode = #tpu.pipeline_mode<synchronous>, transform_indices = @transform_4, window_bounds = array<i64: 1, 384>}, {pipeline_mode = #tpu.pipeline_mode<synchronous>, transform_indices = @transform_5, window_bounds = array<i64: 1, 384>}]} {
    %c0_i32 = arith.constant 0 : i32
    %0 = arith.cmpi eq, %arg0, %c0_i32 : i32
    %1 = arith.extui %0 : i1 to i32
    %c0_i32_0 = arith.constant 0 : i32
    %2 = arith.cmpi ne, %1, %c0_i32_0 : i32
    scf.if %2 {
      %cst_15 = arith.constant 0.000000e+00 : f32
      %20 = vector.broadcast %cst_15 : f32 to vector<1x384xf32>
      %c0_16 = arith.constant 0 : index
      %c0_17 = arith.constant 0 : index
      %21 = vector.load %arg7[%c0_16, %c0_17] : memref<1x384xf32, #tpu.memory_space<vmem>>, vector<1x384xf32>
      tpu.vector_store %arg7[%c0_16, %c0_17], %20 {strides = array<i32>} : memref<1x384xf32, #tpu.memory_space<vmem>>, vector<1x384xf32>,
      %cst_18 = arith.constant 0.000000e+00 : f32
      %22 = vector.broadcast %cst_18 : f32 to vector<1x384xf32>
      %c0_19 = arith.constant 0 : index
      %c0_20 = arith.constant 0 : index
      %23 = vector.load %arg8[%c0_19, %c0_20] : memref<1x384xf32, #tpu.memory_space<vmem>>, vector<1x384xf32>
      tpu.vector_store %arg8[%c0_19, %c0_20], %22 {strides = array<i32>} : memref<1x384xf32, #tpu.memory_space<vmem>>, vector<1x384xf32>,
    } else {
    }
    %c0 = arith.constant 0 : index
    %c0_1 = arith.constant 0 : index
    %3 = vector.load %arg1[%c0, %c0_1] : memref<48x48xf32, #tpu.memory_space<vmem>>, vector<48x48xf32>
    %c0_2 = arith.constant 0 : index
    %c0_3 = arith.constant 0 : index
    %4 = vector.load %arg2[%c0_2, %c0_3] : memref<48x384xf32, #tpu.memory_space<vmem>>, vector<48x384xf32>
    %cst = arith.constant dense<0.000000e+00> : vector<48x384xf32>
    %5 = tpu.matmul %3, %4, %cst {dimension_numbers = #tpu.dot_dimension_numbers<[1], [0], [0], [1], [0, 0, 1, 1], [], []>} : vector<48x48xf32>, vector<48x384xf32>, vector<48x384xf32> -> vector<48x384xf32>
    %c0_4 = arith.constant 0 : index
    %c0_5 = arith.constant 0 : index
    %6 = vector.load %arg7[%c0_4, %c0_5] : memref<1x384xf32, #tpu.memory_space<vmem>>, vector<1x384xf32>
    %cst_6 = arith.constant dense<0.000000e+00> : vector<384xf32>
    %7 = vector.multi_reduction <add>, %5, %cst_6 [0] : vector<48x384xf32> to vector<384xf32>
    %8 = vector.shape_cast %7 : vector<384xf32> to vector<1x384xf32>
    %9 = arith.addf %6, %8 : vector<1x384xf32>
    %c0_7 = arith.constant 0 : index
    %c0_8 = arith.constant 0 : index
    %10 = vector.load %arg7[%c0_7, %c0_8] : memref<1x384xf32, #tpu.memory_space<vmem>>, vector<1x384xf32>
    tpu.vector_store %arg7[%c0_7, %c0_8], %9 {strides = array<i32>} : memref<1x384xf32, #tpu.memory_space<vmem>>, vector<1x384xf32>,
    %c0_9 = arith.constant 0 : index
    %c0_10 = arith.constant 0 : index
    %11 = vector.load %arg8[%c0_9, %c0_10] : memref<1x384xf32, #tpu.memory_space<vmem>>, vector<1x384xf32>
    %12 = arith.mulf %5, %5 : vector<48x384xf32>
    %cst_11 = arith.constant dense<0.000000e+00> : vector<384xf32>
    %13 = vector.multi_reduction <add>, %12, %cst_11 [0] : vector<48x384xf32> to vector<384xf32>
    %14 = vector.shape_cast %13 : vector<384xf32> to vector<1x384xf32>
    %15 = arith.addf %11, %14 : vector<1x384xf32>
    %c0_12 = arith.constant 0 : index
    %c0_13 = arith.constant 0 : index
    %16 = vector.load %arg8[%c0_12, %c0_13] : memref<1x384xf32, #tpu.memory_space<vmem>>, vector<1x384xf32>
    tpu.vector_store %arg8[%c0_12, %c0_13], %15 {strides = array<i32>} : memref<1x384xf32, #tpu.memory_space<vmem>>, vector<1x384xf32>,
    %c2_i32 = arith.constant 2 : i32
    %17 = arith.cmpi eq, %arg0, %c2_i32 : i32
    %18 = arith.extui %17 : i1 to i32
    %c0_i32_14 = arith.constant 0 : i32
    %19 = arith.cmpi ne, %18, %c0_i32_14 : i32
    scf.if %19 {
      %c0_15 = arith.constant 0 : index
      %c0_16 = arith.constant 0 : index
      %20 = vector.load %arg7[%c0_15, %c0_16] : memref<1x384xf32, #tpu.memory_space<vmem>>, vector<1x384xf32>
      %cst_17 = arith.constant 7.812500e-03 : f32
      %21 = vector.broadcast %cst_17 : f32 to vector<1x384xf32>
      %22 = arith.mulf %20, %21 : vector<1x384xf32>
      %c0_18 = arith.constant 0 : index
      %c0_19 = arith.constant 0 : index
      %23 = vector.load %arg8[%c0_18, %c0_19] : memref<1x384xf32, #tpu.memory_space<vmem>>, vector<1x384xf32>
      %cst_20 = arith.constant 7.812500e-03 : f32
      %24 = vector.broadcast %cst_20 : f32 to vector<1x384xf32>
      %25 = arith.mulf %23, %24 : vector<1x384xf32>
      %26 = arith.mulf %22, %22 : vector<1x384xf32>
      %27 = arith.subf %25, %26 : vector<1x384xf32>
      %cst_21 = arith.constant 0.000000e+00 : f32
      %28 = vector.broadcast %cst_21 : f32 to vector<1x384xf32>
      %29 = arith.maximumf %27, %28 : vector<1x384xf32>
      %c0_22 = arith.constant 0 : index
      %c0_23 = arith.constant 0 : index
      %30 = vector.load %arg3[%c0_22, %c0_23] : memref<1x384xf32, #tpu.memory_space<vmem>>, vector<1x384xf32>
      %cst_24 = arith.constant 9.99999997E-7 : f32
      %31 = vector.broadcast %cst_24 : f32 to vector<1x384xf32>
      %32 = arith.addf %29, %31 : vector<1x384xf32>
      %33 = math.rsqrt %32 : vector<1x384xf32>
      %34 = arith.mulf %30, %33 : vector<1x384xf32>
      %c0_25 = arith.constant 0 : index
      %c0_26 = arith.constant 0 : index
      %35 = vector.load %arg5[%c0_25, %c0_26] : memref<1x384xf32, #tpu.memory_space<vmem>>, vector<1x384xf32>
      tpu.vector_store %arg5[%c0_25, %c0_26], %34 {strides = array<i32>} : memref<1x384xf32, #tpu.memory_space<vmem>>, vector<1x384xf32>,
      %c0_27 = arith.constant 0 : index
      %c0_28 = arith.constant 0 : index
      %36 = vector.load %arg4[%c0_27, %c0_28] : memref<1x384xf32, #tpu.memory_space<vmem>>, vector<1x384xf32>
      %37 = arith.mulf %22, %34 : vector<1x384xf32>
      %38 = arith.subf %36, %37 : vector<1x384xf32>
      %c0_29 = arith.constant 0 : index
      %c0_30 = arith.constant 0 : index
      %39 = vector.load %arg6[%c0_29, %c0_30] : memref<1x384xf32, #tpu.memory_space<vmem>>, vector<1x384xf32>
      tpu.vector_store %arg6[%c0_29, %c0_30], %38 {strides = array<i32>} : memref<1x384xf32, #tpu.memory_space<vmem>>, vector<1x384xf32>,
    } else {
    }
    return
  }
  func.func @transform_0(%arg0: i32) -> (i32, i32) {
    %c0_i32 = arith.constant 0 : i32
    %c0_i32_0 = arith.constant 0 : i32
    return %arg0, %c0_i32 : i32, i32
  }
  func.func @transform_1(%arg0: i32) -> (i32, i32) {
    %c0_i32 = arith.constant 0 : i32
    %c0_i32_0 = arith.constant 0 : i32
    %c0_i32_1 = arith.constant 0 : i32
    return %c0_i32, %c0_i32_0 : i32, i32
  }
  func.func @transform_2(%arg0: i32) -> (i32, i32) {
    %c0_i32 = arith.constant 0 : i32
    %c0_i32_0 = arith.constant 0 : i32
    %c0_i32_1 = arith.constant 0 : i32
    return %c0_i32, %c0_i32_0 : i32, i32
  }
  func.func @transform_3(%arg0: i32) -> (i32, i32) {
    %c0_i32 = arith.constant 0 : i32
    %c0_i32_0 = arith.constant 0 : i32
    %c0_i32_1 = arith.constant 0 : i32
    return %c0_i32, %c0_i32_0 : i32, i32
  }
  func.func @transform_4(%arg0: i32) -> (i32, i32) {
    %c0_i32 = arith.constant 0 : i32
    %c0_i32_0 = arith.constant 0 : i32
    %c0_i32_1 = arith.constant 0 : i32
    return %c0_i32, %c0_i32_0 : i32, i32
  }
  func.func @transform_5(%arg0: i32) -> (i32, i32) {
    %c0_i32 = arith.constant 0 : i32
    %c0_i32_0 = arith.constant 0 : i32
    %c0_i32_1 = arith.constant 0 : i32
    return %c0_i32, %c0_i32_0 : i32, i32
  }
}

</mosaic_0001>

<bundles_post_ra>
// kernel: tpu_custom_call.1
= control target key start
LH: loop header
LB: loop body
LE: loop exit
PB: predicated region body
PF: predicated region fallthrough
CT: control target
= control target key end

     0   :  { %11 = vsyncpa [#allocation5], 0  ;;  %s1015_s0 = inlined_call_operand.vmem [shape: f32[144,48], index: 0, kind: input, shape index: {}]   ;;  %s1016_s1 = inlined_call_operand.vmem [shape: f32[48,384], index: 1, kind: input, shape index: {}]   ;;  %s1017_s2 = inlined_call_operand.vmem [shape: f32[1,384], index: 2, kind: input, shape index: {}]   ;;  %s1018_s3 = inlined_call_operand.vmem [shape: f32[1,384], index: 3, kind: input, shape index: {}]   ;;  %s1019_s4 = inlined_call_operand.hbm [shape: f32[1,384], index: 4, kind: output, shape index: {0}]   ;;  %s1020_s5 = inlined_call_operand.hbm [shape: f32[1,384], index: 5, kind: output, shape index: {1}]  }
   0x1   :  { %12 = vsyncpa [#allocation7], 0  ;;  %s881_s18 = smov 0  }
   0x2 LB: > { %s887_s19 = sadd.s32 4294967295, %s844_s18   ;;  %p700_p0 = scmp.ge.s32.totalorder %s844_s18, 1  ;;  %s844_s18 = sphi %s881_s18, %s18_s18  }
   0x3   : > { %p183_p1 = scmp.lt.s32.totalorder %s844_s18, 4 }
   0x5   : > { %p184_p2 = pnand %p700_p0, %p183_p1 }
   0x6   : > { %s206_s20 = smul.u32 (!%p184_p2), 6, %s887_s19  ;;  %p702_p4 = scmp.ne.s32.totalorder (!%p184_p2), %s887_s19, 0 }
   0x7   : > { %187 = sbr.rel (%p184_p2) target bundleno = 340 (0x154), region = 36 }
   0x8   : > { %p207_p3 = scmp.lt.s32.totalorder (!%p184_p2), %s206_s20, 17 }
   0xc   : > { %s1024_s20 = smov (!%p207_p3, %s206_s20), 17  ;;  %215 = sbr.rel (%p702_p4) target bundleno = 21 (0x15), region = 40 }
   0xd   : > { %s701_s21 = sshll.u32 %s1024_s20, 3 }
   0xe   : > { %s895_s24 = scalar_lea.vmem %s1015_s0, %s701_s21 }
  0x11   : > { %v216_v0 = vlaneseq  ;;  %v846_v1 = vmov 0.0  }
  0x13   : > { %vm218_vm0 = vcmp.lt.s32.totalorder %v216_v0, 384 }
  0x14   : > { %220 = vst.msk [vmem:[#allocation2] sm:$0x7] %vm218_vm0, %v846_v1  ;;  %221 = vst.msk [vmem:[#allocation3] sm:$0x7] %vm218_vm0, %v846_v1 }
  0x15 PF: > { %v244_v2 = vld [vmem:[%s1016_s1 + $0x80] sm:$0xff]  ;;  %v243_v3 = vld [vmem:[%s1016_s1 + $0x78] sm:$0xff]  ;;  %v241_v4 = vld [vmem:[%s1016_s1 + $0x68] sm:$0xff]  ;;  %v847_v7 = vmov 0.0   ;;  %vm246_vm1 = vcmask 392192   ;;  %p715_p5 = scmp.ne.s32.totalorder %s887_s19, 2 }
  0x16   : > { %285 = vmatprep.subr.mxu0 %v244_v2  ;;  %v245_v5 = vld [vmem:[%s1016_s1 + $0x88] sm:$0xff]  ;;  %v240_v6 = vld [vmem:[%s1016_s1 + $0x60] sm:$0xff]  ;;  %329 = vmatprep.mubr.f32.mxu0 %v847_v7  ;;  %v238_v8 = vld [vmem:[%s1016_s1 + $0x50] sm:$0xff] }
  0x17   : > { %286 = vmatpush1.msra.mxu0 %v243_v3  ;;  %734 = vmatprep.subr.mxu1 %v245_v5  ;;  %v242_v9 = vld [vmem:[%s1016_s1 + $0x70] sm:$0xff]  ;;  %v237_v10 = vld [vmem:[%s1016_s1 + $0x48] sm:$0xff]  ;;  %v239_v11 = vld [vmem:[%s1016_s1 + $0x58] sm:$0xff] }
  0x18   : > { %287 = vmatprep.subr.mxu0 %v241_v4  ;;  %735 = vmatpush3.msra.mxu1 %v245_v5  ;;  %v235_v12 = vld [vmem:[%s1016_s1 + $0x38] sm:$0xff]  ;;  %v234_v13 = vld [vmem:[%s1016_s1 + $0x30] sm:$0xff]  ;;  %v236_v14 = vld [vmem:[%s1016_s1 + $0x40] sm:$0xff] }
  0x19   : > { %288 = vmatpush1.msra.mxu0 %v240_v6  ;;  %736 = vmatprep.subr.mxu1 %v242_v9  ;;  %v232_v15 = vld [vmem:[%s1016_s1 + $0x20] sm:$0xff]  ;;  %v231_v16 = vld [vmem:[%s1016_s1 + $0x18] sm:$0xff]  ;;  %v233_v17 = vld [vmem:[%s1016_s1 + $0x28] sm:$0xff] }
  0x1a   : > { %289 = vmatprep.subr.mxu0 %v238_v8  ;;  %737 = vmatpush3.msra.mxu1 %v242_v9  ;;  %v229_v18 = vld [vmem:[%s1016_s1 + $0x8] sm:$0xff]  ;;  %v228_v19 = vld [vmem:[%s1016_s1] sm:$0xff]  ;;  %v230_v20 = vld [vmem:[%s1016_s1 + $0x10] sm:$0xff] }
  0x1b   : > { %290 = vmatpush1.msra.mxu0 %v237_v10  ;;  %738 = vmatprep.subr.mxu1 %v239_v11  ;;  %v222_v21 = vld [vmem:[%s895_s24] sm:$0xff]  ;;  %v223_v22 = vld [vmem:[%s895_s24 + $0x8] sm:$0xff]  ;;  %v224_v23 = vld [vmem:[%s895_s24 + $0x10] sm:$0xff] }
  0x1c   : > { %291 = vmatprep.subr.mxu0 %v235_v12  ;;  %739 = vmatpush3.msra.mxu1 %v239_v11  ;;  %v225_v24 = vld [vmem:[%s895_s24 + $0x18] sm:$0xff]  ;;  %v226_v25 = vld [vmem:[%s895_s24 + $0x20] sm:$0xff]  ;;  %v227_v26 = vld [vmem:[%s895_s24 + $0x28] sm:$0xff] }
  0x1d   : > { %292 = vmatpush1.msra.mxu0 %v234_v13  ;;  %740 = vmatprep.subr.mxu1 %v236_v14 }
  0x1e   : > { %293 = vmatprep.subr.mxu0 %v232_v15  ;;  %741 = vmatpush3.msra.mxu1 %v236_v14 }
  0x1f   : > { %294 = vmatpush1.msra.mxu0 %v231_v16  ;;  %742 = vmatprep.subr.mxu1 %v233_v17 }
  0x20   : > { %295 = vmatprep.subr.mxu0 %v229_v18  ;;  %743 = vmatpush3.msra.mxu1 %v233_v17 }
  0x21   : > { %296 = vmatpush1.msra.mxu0 %v228_v19  ;;  %744 = vmatprep.subr.mxu1 %v230_v20 }
  0x22   : > { %703 = vmatmul.mubr.msk.f32.vlgmr.msra.gmra.mxu0 %vm246_vm1, %v222_v21  ;;  %745 = vmatpush3.msra.mxu1 %v230_v20 }
  0x23   : > { %746 = vmatprep.mubr.msk.f32.mxu1 %vm246_vm1, %v222_v21  ;;  %335 = vmatprep.mubr.f32.mxu0 %v847_v7 }
  0x24   : > { %747 = vmatmul.mubr.msk.f32.vlgmr.msra.gmra.mxu1 %vm246_vm1, %v223_v22 }
  0x25   : > { %749 = vmatprep.mubr.msk.f32.mxu1 %vm246_vm1, %v224_v23 }
  0x26   : > { %704 = vmatmul.mubr.msk.f32.gmra.mxu0 %vm246_vm1, %v223_v22 }
  0x27   : > { %341 = vmatprep.mubr.f32.mxu0 %v847_v7 }
  0x28   : > { %750 = vmatmul.mubr.msk.f32.gmra.mxu1 %vm246_vm1, %v225_v24 }
  0x29   : > { %752 = vmatprep.mubr.msk.f32.mxu1 %vm246_vm1, %v226_v25 }
  0x2a   : > { %705 = vmatmul.mubr.msk.f32.gmra.mxu0 %vm246_vm1, %v224_v23 }
  0x2b   : > { %347 = vmatprep.mubr.f32.mxu0 %v847_v7 }
  0x2c   : > { %753 = vmatmul.mubr.msk.f32.gmra.mxu1 %vm246_vm1, %v227_v26 }
  0x2e   : > { %706 = vmatmul.mubr.msk.f32.gmra.mxu0 %vm246_vm1, %v225_v24 }
  0x2f   : > { %353 = vmatprep.mubr.f32.mxu0 %v847_v7 }
  0x32   : > { %707 = vmatmul.mubr.msk.f32.gmra.mxu0 %vm246_vm1, %v226_v25 }
  0x33   : > { %359 = vmatprep.mubr.f32.mxu0 %v847_v7 }
  0x36   : > { %708 = vmatmul.mubr.msk.f32.gmra.mxu0 %vm246_vm1, %v227_v26 }
  0xe2   : > { %v331_v27 = vpop.f32.mrf.mxu0 }
  0xe3   : > { %v529_v46 = vmul.f32 %v331_v27, %v331_v27 }
  0xe4   : > { %v333_v28 = vpop.f32.mrf.mxu0  ;;  %v748_v29 = vpop.f32.mrf.mxu1 }
  0xe5   : > { %v534_v30 = vmul.f32 %v748_v29, %v748_v29  ;;  %v530_v52 = vmul.f32 %v333_v28, %v333_v28 }
  0xe6   : > { %v337_v31 = vpop.f32.mrf.mxu0  ;;  %v432_v32 = vpop.f32.mrf.mxu1 }
  0xe7   : > { %v484_v33 = vadd.f32 %v748_v29, %v432_v32  ;;  %v531_v34 = vmul.f32 %v432_v32, %v432_v32  ;;  %v532_v45 = vmul.f32 %v337_v31, %v337_v31  ;;  %v462_v53 = vadd.f32 %v337_v31, %v331_v27 }
  0xe8   : > { %v339_v35 = vpop.f32.mrf.mxu0  ;;  %v751_v36 = vpop.f32.mrf.mxu1 }
  0xe9   : > { %v569_v37 = vadd.f32 %v534_v30, %v531_v34  ;;  %v540_v41 = vmul.f32 %v751_v36, %v751_v36  ;;  %v533_v47 = vmul.f32 %v339_v35, %v339_v35  ;;  %v547_v61 = vadd.f32 %v532_v45, %v529_v46 }
  0xea   : > { %v343_v38 = vpop.f32.mrf.mxu0  ;;  %v442_v39 = vpop.f32.mrf.mxu1  ;;  %v473_v62 = vadd.f32 %v339_v35, %v333_v28 }
  0xeb   : > { %v485_v40 = vadd.f32 %v484_v33, %v442_v39  ;;  %v537_v42 = vmul.f32 %v442_v39, %v442_v39  ;;  %v535_v54 = vmul.f32 %v343_v38, %v343_v38  ;;  %v463_v63 = vadd.f32 %v462_v53, %v343_v38 }
  0xec   : > { %v345_v43 = vpop.f32.mrf.mxu0  ;;  %v754_v44 = vpop.f32.mrf.mxu1  ;;  %v558_v1 = vadd.f32 %v533_v47, %v530_v52 }
  0xed   : > { %v570_v48 = vadd.f32 %v569_v37, %v537_v42  ;;  %v486_v51 = vadd.f32 %v751_v36, %v485_v40  ;;  %v536_v56 = vmul.f32 %v345_v43, %v345_v43  ;;  %v546_v57 = vmul.f32 %v754_v44, %v754_v44 }
  0xee   : > { %v349_v49 = vpop.f32.mrf.mxu0  ;;  %v452_v50 = vpop.f32.mrf.mxu1  ;;  %v548_v6 = vadd.f32 %v547_v61, %v535_v54  ;;  %v474_v7 = vadd.f32 %v473_v62, %v345_v43  ;;  %v848_v40 = vmov 1966171168   ;;  %v502_v42 = vlaneseq }
  0xef   : > { %v543_v55 = vmul.f32 %v452_v50, %v452_v50  ;;  %v487_v58 = vadd.f32 %v486_v51, %v452_v50  ;;  %v571_v59 = vadd.f32 %v570_v48, %v540_v41  ;;  %v538_v0 = vmul.f32 %v349_v49, %v349_v49 }
  0xf0   : > { %v351_v60 = vpop.f32.mrf.mxu0  ;;  %v464_v8 = vadd.f32 %v463_v63, %v349_v49  ;;  %v559_v10 = vadd.f32 %v558_v1, %v536_v56  ;;  %v500_v41 = vunpack.c.l.s4 %v848_v40  ;;  %v503_v54 = vshrl.u32 %v502_v42, 7 }
  0xf1   : > { %v488_v2 = vadd.f32 %v754_v44, %v487_v58  ;;  %v572_v3 = vadd.f32 %v571_v59, %v543_v55  ;;  %v539_v4 = vmul.f32 %v351_v60, %v351_v60  ;;  %v549_v14 = vadd.f32 %v548_v6, %v538_v0 }
  0xf2   : > { %v355_v5 = vpop.f32.mrf.mxu0  ;;  %v475_v15 = vadd.f32 %v474_v7, %v351_v60  ;;  %v501_v53 = vunpack.c.0.s8 %v500_v41  ;;  %vm970_vm2 = vcmp.lt.s32.totalorder %v502_v42, 384 }
  0xf3   : > { %v541_v9 = vmul.f32 %v355_v5, %v355_v5  ;;  %v489_v11 = vrot.slane %v488_v2, 4  ;;  %v573_v12 = vadd.f32 %v572_v3, %v546_v57  ;;  %v465_v16 = vadd.f32 %v464_v8, %v355_v5 }
  0xf4   : > { %v357_v13 = vpop.f32.mrf.mxu0  ;;  %v560_v20 = vadd.f32 %v559_v10, %v539_v4  ;;  %v504_v63 = vsub.s32 %v501_v53, %v503_v54 }
  0xf5   : > { %v542_v17 = vmul.f32 %v357_v13, %v357_v13  ;;  %v490_v18 = vadd.f32 %v489_v11, %v488_v2  ;;  %v574_v19 = vrot.slane %v573_v12, 4  ;;  %v550_v22 = vadd.f32 %v549_v14, %v541_v9  ;;  %v461_v14 = vld [vmem:[#allocation2] sm:$0x7] }
  0xf6   : > { %v361_v21 = vpop.f32.mrf.mxu0  ;;  %v476_v23 = vadd.f32 %v475_v15, %v357_v13 }
  0xf7   : > { %v466_v24 = vadd.f32 %v465_v16, %v361_v21  ;;  %v544_v25 = vmul.f32 %v361_v21, %v361_v21  ;;  %v491_v26 = vrot.slane %v490_v18, 2  ;;  %v575_v27 = vadd.f32 %v574_v19, %v573_v12 }
  0xf8   : > { %v561_v28 = vadd.f32 %v560_v20, %v542_v17  ;;  %v363_v29 = vpop.f32.mrf.mxu0 }
  0xf9   : > { %v467_v30 = vrot.slane %v466_v24, 4  ;;  %v551_v31 = vadd.f32 %v550_v22, %v544_v25  ;;  %v477_v32 = vadd.f32 %v476_v23, %v363_v29  ;;  %v545_v33 = vmul.f32 %v363_v29, %v363_v29 }
  0xfa   : > { %v576_v34 = vrot.slane %v575_v27, 2  ;;  %v492_v39 = vadd.f32 %v491_v26, %v490_v18  ;;  %v528_v18 = vld [vmem:[#allocation3] sm:$0x7] }
  0xfb   : > { %v468_v35 = vadd.f32 %v467_v30, %v466_v24  ;;  %v552_v36 = vrot.slane %v551_v31, 4  ;;  %v478_v37 = vrot.slane %v477_v32, 4  ;;  %v562_v38 = vadd.f32 %v561_v28, %v545_v33 }
  0xfc   : > { %v577_v47 = vadd.f32 %v576_v34, %v575_v27  ;;  %v493_v52 = vrot.slane %v492_v39, 1 }
  0xfd   : > { %v469_v43 = vrot.slane %v468_v35, 2  ;;  %v553_v44 = vadd.f32 %v552_v36, %v551_v31  ;;  %v479_v45 = vadd.f32 %v478_v37, %v477_v32  ;;  %v563_v46 = vrot.slane %v562_v38, 4 }
  0xfe   : > { %v578_v59 = vrot.slane %v577_v47, 1  ;;  %v494_v0 = vadd.f32 %v493_v52, %v492_v39 }
  0xff   : > { %v470_v48 = vadd.f32 %v469_v43, %v468_v35  ;;  %v554_v49 = vrot.slane %v553_v44, 2  ;;  %v480_v50 = vrot.slane %v479_v45, 2  ;;  %v564_v51 = vadd.f32 %v563_v46, %v562_v38 }
 0x100   : > { %v579_v4 = vadd.f32 %v578_v59, %v577_v47  ;;  %v512_v8 = vrot.slane %v494_v0, %v504_v63 }
 0x101   : > { %v471_v55 = vrot.slane %v470_v48, 1  ;;  %v555_v56 = vadd.f32 %v554_v49, %v553_v44  ;;  %v481_v57 = vadd.f32 %v480_v50, %v479_v45  ;;  %v565_v58 = vrot.slane %v564_v51, 2 }
 0x102   : > { %v597_v11 = vrot.slane %v579_v4, %v504_v63 }
 0x103   : > { %v556_v60 = vrot.slane %v555_v56, 1  ;;  %v482_v61 = vrot.slane %v481_v57, 1  ;;  %v566_v62 = vadd.f32 %v565_v58, %v564_v51  ;;  %v472_v1 = vadd.f32 %v471_v55, %v470_v48 }
 0x105   : > { %v483_v2 = vadd.f32 %v482_v61, %v481_v57  ;;  %v567_v3 = vrot.slane %v566_v62, 1  ;;  %v557_v5 = vadd.f32 %v556_v60, %v555_v56 }
 0x107   : > { %v498_v6 = vcombine.low %v472_v1, %v483_v2  ;;  %v568_v7 = vadd.f32 %v567_v3, %v566_v62 }
 0x109   : > { %v505_v9 = vrot.slane %v498_v6, %v504_v63  ;;  %v583_v10 = vcombine.low %v557_v5, %v568_v7 }
 0x10b   : > { %v513_v12 = vcombine.low %v505_v9, %v512_v8  ;;  %v590_v13 = vrot.slane %v583_v10, %v504_v63 }
 0x10d   : > { %v520_v15 = vrot.slane %v513_v12, %v504_v63  ;;  %v598_v16 = vcombine.low %v590_v13, %v597_v11 }
 0x10f   : > { %v522_v19 = vadd.f32 %v520_v15, %v461_v14  ;;  %v605_v20 = vrot.slane %v598_v16, %v504_v63  ;;  %612 = sbr.rel (%p715_p5) target bundleno = 312 (0x138), region = 44 }
 0x111   : > { %527 = vst.msk [vmem:[#allocation2] sm:$0x7] %vm970_vm2, %v522_v19  ;;  %v607_v21 = vadd.f32 %v605_v20, %v528_v18 }
 0x113   : > { %608 = vst.msk [vmem:[#allocation3] sm:$0x7] %vm970_vm2, %v607_v21 }
 0x114   : > { %v620_v30 = vld [vmem:[%s1017_s2] sm:$0x7] }
 0x115   : > { %v625_v33 = vld [vmem:[%s1018_s3] sm:$0x7] }
 0x118   : > { %v613_v22 = vld [vmem:[#allocation2] sm:$0x7] }
 0x119   : > { %v614_v24 = vmul.f32 0.0078125, %v613_v22 }
 0x11a   : > { %v615_v23 = vld [vmem:[#allocation3] sm:$0x7] }
 0x11b   : > { %v616_v25 = vmul.f32 0.0078125, %v615_v23  ;;  %v617_v26 = vmul.f32 %v614_v24, %v614_v24 }
 0x11d   : > { %v618_v27 = vsub.f32 %v616_v25, %v617_v26 }
 0x11f   : > { %v619_v28 = vmax.f32 %v618_v27, 0.0 }
 0x121   : > { %v621_v29 = vadd.f32 1e-06, %v619_v28 }
 0x123   : > { %780 = vrsqrt.f32 %v621_v29 }
 0x130   : > { %v781_v31 = vpop.eup %780 }
 0x131   : > { %v623_v32 = vmul.f32 %v781_v31, %v620_v30 }
 0x133   : > { %624 = vst.msk [vmem:[#allocation4] sm:$0x7] %vm970_vm2, %v623_v32  ;;  %v626_v34 = vmul.f32 %v623_v32, %v614_v24 }
 0x135   : > { %v627_v35 = vsub.f32 %v625_v33, %v626_v34 }
 0x137   : > { %628 = vst.msk [vmem:[#allocation6] sm:$0x7] %vm970_vm2, %v627_v35 }
 0x138 PF: > { %p763_p6 = scmp.eq.s32.totalorder %s887_s19, 2  ;;  %s849_s17 = smov [#allocation4]  }
 0x139   : > { %s636_s20 = sshll.u32 %s849_s17, 4  ;;  %s850_s21 = smov [#allocation6]   ;;  %s637_s20 = int_to_ptr.vmem [resolvable:$true] %s636_s20 }
 0x13a   : > { %s647_s22 = sshll.u32 %s850_s21, 4  ;;  %s782_s23 = scalar_lea.vmem %s637_s20, 48  ;;  %s648_s22 = int_to_ptr.vmem [resolvable:$true] %s647_s22 }
 0x13b   : > { %p783_p7 = scmp.ne.s32.totalorder %s637_s20, %s782_s23  ;;  %s788_s25 = scalar_lea.vmem %s637_s20, 64 }
 0x13c   : > { %p789_p10 = scmp.lt.s32.totalorder %s637_s20, %s637_s20  ;;  %p790_p11 = scmp.lt.s32.totalorder %s788_s25, %s782_s23 }
 0x13d   : > { %p784_p8 = pnand %p783_p7, %p763_p6 }
 0x13e   : > { %p791_p12 = por %p790_p11, %p789_p10 }
 0x13f   : > { %p785_p9 = pneg %p784_p8 }
 0x141   : > { %p792_p13 = pnand %p791_p12, %p785_p9 }
 0x143   : > { %795 = shalt.err (!%p792_p13)
}
 0x144   : > { %756 = dma.vmem_to_hbm [thread:$0]  (%p763_p6), %s637_s20, 48, %s1019_s4, [#allocation5]  }
 0x145   : > { %s806_s28 = scalar_lea.vmem %s648_s22, 48  ;;  %s812_s29 = scalar_lea.vmem %s648_s22, 64 }
 0x146   : > { %p807_p0 = scmp.ne.s32.totalorder %s648_s22, %s806_s28  ;;  %p813_p3 = scmp.lt.s32.totalorder %s648_s22, %s648_s22 }
 0x147   : > { %p814_p4 = scmp.lt.s32.totalorder %s812_s29, %s806_s28 }
 0x148   : > { %p808_p1 = pnand %p807_p0, %p763_p6 }
 0x149   : > { %p815_p5 = por %p814_p4, %p813_p3 }
 0x14a   : > { %p809_p2 = pneg %p808_p1 }
 0x14c   : > { %p816_p7 = pnand %p815_p5, %p809_p2 }
 0x14e   : > { %819 = shalt.err (!%p816_p7)
}
 0x14f   : > { %758 = dma.vmem_to_hbm [thread:$0]  (%p763_p6), %s648_s22, 48, %s1020_s5, [#allocation7]  }
 0x150   : > { %835 = dma.done.wait (%p763_p6), [#allocation5], 48  }
 0x151   : > { %837 = vsyncadd (%p763_p6), [#allocation5], 4294967248 }
 0x152   : > { %839 = dma.done.wait (%p763_p6), [#allocation7], 48  }
 0x153   : > { %841 = vsyncadd (%p763_p6), [#allocation7], 4294967248 }
 0x154 PF: > { %s18_s18 = sadd.s32 1, %s844_s18  }
 0x155   : > { %p15_p8 = scmp.ge.s32.totalorder %s18_s18, 5  }
 0x157   :  { %17 = sbr.rel (!%p15_p8) target bundleno = 2 (0x2), region = 79 }
 0x15c   :  { %664 = vsyncpa [#allocation5], 1 }
 0x15d   :  { %666 = vsyncpa [#allocation5 + $0x1], 1 }
 0x15e   :  { %667 = vsyncpa [#allocation7], 1 }

</bundles_post_ra>
